<compile_context>
chip_gen: v6e
topology: v6e:2x2x1
jax: 0.10.0
libtpu: 0.0.40
codegen_flags: <defaults>
</compile_context>

<pallas_src>
import math
import jax
import jax.numpy as jnp
from jax.experimental import pallas as pl
from jax.experimental.pallas import tpu as pltpu

# small, self-consistent shapes
B, S, D = 2, 8, 32          # batch, sequence length, d_model
H = 4                       # number of heads
DK = D // H                 # head dim
DFF = 64                    # feed-forward hidden dim
EPS = 1e-6
NEG = -1.0e9


def _make_kernel(batch_block):
    """Kernel processing `batch_block` batches (rows packed as (batch_block*S, D))."""

    N = batch_block * H      # number of (batch, head) pairs handled per invocation

    def kernel(x_ref, mask_ref,
               wqkv_ref, wo_ref,
               w1_ref, b1_ref, w2_ref, b2_ref,
               a1_ref, g1_ref, a2_ref, g2_ref,
               o_ref):
        x = x_ref[...]                                   # (batch_block*S, D)

        def layernorm(z, alpha, beta):
            mean = jnp.mean(z, axis=-1, keepdims=True)
            # torch.std default is unbiased (ddof = 1)
            var = jnp.sum((z - mean) ** 2, axis=-1, keepdims=True) * (1.0 / (D - 1))
            inv = pl.reciprocal(jnp.sqrt(var) + EPS, approx=True)   # EUP slot
            return alpha * (z - mean) * inv + beta

        # -------- sublayer 1: pre-norm multi-head self-attention + residual ----
        xn = layernorm(x, a1_ref[...], g1_ref[...])

        # Fused QKV projection: one MXU push for Q, K and V over all rows.
        # 1/sqrt(d_k) is already folded into the Q columns of wqkv (host side).
        qkv = jnp.dot(xn, wqkv_ref[...], preferred_element_type=jnp.float32)  # (rows, 3D)

        # Stack all (batch, head) pairs along a *major* axis (no lane concat);
        # n = b*H + h.  Static slicing, tiny and fully unrolled at trace time.
        def gather(col0):
            return jnp.stack(
                [qkv[b * S:(b + 1) * S, col0 + h * DK: col0 + (h + 1) * DK]
                 for b in range(batch_block) for h in range(H)],
                axis=0)                                   # (N, S, DK)

        qh = gather(0)
        kh = gather(D)
        vh = gather(2 * D)

        # Mask per (batch, head): exact masked_fill(mask == 1, -1e9) semantics.
        cond = jnp.stack(
            [mask_ref[b] for b in range(batch_block) for _ in range(H)],
            axis=0) == 1.0                                # (N, 1, S) bool

        # Single batched-over-(batch*head) contraction per stage.
        scores = jnp.einsum('nqd,nkd->nqk', qh, kh,
                            preferred_element_type=jnp.float32)       # (N, S, S)
        scores = jnp.where(cond, NEG, scores)

        scores = scores - jnp.max(scores, axis=-1, keepdims=True)
        p = jnp.exp(scores)
        p = p * pl.reciprocal(jnp.sum(p, axis=-1, keepdims=True), approx=True)

        ctx = jnp.einsum('nqk,nkd->nqd', p, vh,
                         preferred_element_type=jnp.float32)          # (N, S, DK)

        # Per-head output projection (wo passed as (N, DK, D), tiled on host);
        # equivalent to concat(heads) @ W_o but without a lane concatenate.
        proj = jnp.einsum('nqd,ndm->nqm', ctx, wo_ref[...],
                          preferred_element_type=jnp.float32)         # (N, S, D)

        # Sum heads within each batch and repack rows as (batch_block*S, D).
        attn_parts = []
        for b in range(batch_block):                      # static, tiny
            acc = proj[b * H]
            for h in range(1, H):
                acc = acc + proj[b * H + h]
            attn_parts.append(acc)                        # (S, D)
        attn = attn_parts[0] if batch_block == 1 else jnp.concatenate(attn_parts, axis=0)

        # TODO(synk): dropout layers are identity here (inference / p=0 semantics).
        x1 = x + attn

        # -------- sublayer 2: pre-norm feed-forward + residual -------------------
        xn2 = layernorm(x1, a2_ref[...], g2_ref[...])
        h1 = jnp.dot(xn2, w1_ref[...], preferred_element_type=jnp.float32) + b1_ref[...]
        h1 = jnp.maximum(h1, 0.0)
        ff = jnp.dot(h1, w2_ref[...], preferred_element_type=jnp.float32) + b2_ref[...]
        o_ref[...] = x1 + ff

    return kernel


def encoder_block(x, seq_mask, params, *, batch_block=None):
    """x: (B, S, D) f32, seq_mask: (B, 1, S) f32 (1 = masked key position)."""
    (wq, wk, wv, wo, w1, b1, w2, b2, a1, g1, a2, g2) = params
    Bx, Sx, Dx = x.shape

    if batch_block is None:
        # Default: one invocation for the whole batch (no per-grid-step pipeline
        # overhead) -- best on single-TensorCore v5e/v6e.  On v7x pass
        # batch_block=1 so the "parallel" batch grid maps one batch per core.
        batch_block = Bx
    assert Bx % batch_block == 0
    num_blocks = Bx // batch_block
    rows = batch_block * Sx

    # Host-side (free) weight prep:
    #  * fold 1/sqrt(d_k) into W_q and fuse Q/K/V into one (D, 3D) weight
    #  * reshape W_o to (H, DK, D) and tile per (batch, head) pair so the
    #    kernel's output projection is a single 3-D batched einsum
    # (weights could also be cast to bf16 here for real-sized D/DFF on v6e/v7x;
    #  kept f32 at this toy size to stay numerically close to the reference)
    wqkv = jnp.concatenate([wq * (1.0 / math.sqrt(DK)), wk, wv], axis=1)
    wo_stack = jnp.tile(wo.reshape(H, DK, D), (batch_block, 1, 1))   # (batch_block*H, DK, D)
    x_flat = x.reshape(Bx * Sx, Dx)          # pack B*S into the sublane dim

    full = lambda shape: pl.BlockSpec(shape, lambda i: tuple(0 for _ in shape))

    out_flat = pl.pallas_call(
        _make_kernel(batch_block),
        out_shape=jax.ShapeDtypeStruct((Bx * Sx, Dx), jnp.float32),
        grid=(num_blocks,),
        in_specs=[
            pl.BlockSpec((rows, Dx), lambda i: (i, 0)),               # x (flattened)
            pl.BlockSpec((batch_block, 1, Sx), lambda i: (i, 0, 0)),  # mask
            full((D, 3 * D)),                          # fused [Wq*scale | Wk | Wv]
            full((batch_block * H, DK, D)),            # Wo per (batch, head)
            full((D, DFF)), full((1, DFF)),            # W1, b1
            full((DFF, D)), full((1, D)),              # W2, b2
            full((1, D)), full((1, D)),                # LN1 alpha, bias
            full((1, D)), full((1, D)),                # LN2 alpha, bias
        ],
        out_specs=pl.BlockSpec((rows, Dx), lambda i: (i, 0)),
        compiler_params=pltpu.CompilerParams(
            dimension_semantics=("parallel",)),
    )(x_flat, seq_mask, wqkv, wo_stack, w1, b1, w2, b2, a1, g1, a2, g2)

    return out_flat.reshape(Bx, Sx, Dx)


def init_params(key):
    ks = jax.random.split(key, 8)
    s = 0.1
    # weights stored pre-transposed: y = x @ W  (equivalent to torch x @ W.T)
    wq = s * jax.random.normal(ks[0], (D, D), jnp.float32)
    wk = s * jax.random.normal(ks[1], (D, D), jnp.float32)
    wv = s * jax.random.normal(ks[2], (D, D), jnp.float32)
    wo = s * jax.random.normal(ks[3], (D, D), jnp.float32)
    w1 = s * jax.random.normal(ks[4], (D, DFF), jnp.float32)
    b1 = s * jax.random.normal(ks[5], (1, DFF), jnp.float32)
    w2 = s * jax.random.normal(ks[6], (DFF, D), jnp.float32)
    b2 = s * jax.random.normal(ks[7], (1, D), jnp.float32)
    # LayerNorm params (PyTorch init: alpha = ones, bias = zeros)
    a1 = jnp.ones((1, D), jnp.float32)
    g1 = jnp.zeros((1, D), jnp.float32)
    a2 = jnp.ones((1, D), jnp.float32)
    g2 = jnp.zeros((1, D), jnp.float32)
    return (wq, wk, wv, wo, w1, b1, w2, b2, a1, g1, a2, g2)


if __name__ == "__main__":
    key = jax.random.PRNGKey(0)
    kx, kp = jax.random.split(key)
    x = jax.random.normal(kx, (B, S, D), jnp.float32)
    # mask: 1 means "masked" (per reference masked_fill(mask == 1, -1e9)).
    # mask out the last two sequence positions in every batch.
    seq_mask = jnp.zeros((B, 1, S), jnp.float32).at[:, :, -2:].set(1.0)
    params = init_params(kp)

    out = encoder_block(x, seq_mask, params)   # single-invocation (v5e/v6e default)
    jax.block_until_ready(out)
    assert out.shape == (B, S, D)
    assert bool(jnp.all(jnp.isfinite(out)))
    print("KERNEL_OK")
</pallas_src>

<mosaic_0001>
module attributes {stable_mosaic.version = 11 : i64} {
  func.func @kernel(%arg0: i32, %arg1: memref<16x32xf32, #tpu.memory_space<vmem>>, %arg2: memref<2x1x8xf32, #tpu.memory_space<vmem>>, %arg3: memref<32x96xf32, #tpu.memory_space<vmem>>, %arg4: memref<8x8x32xf32, #tpu.memory_space<vmem>>, %arg5: memref<32x64xf32, #tpu.memory_space<vmem>>, %arg6: memref<1x64xf32, #tpu.memory_space<vmem>>, %arg7: memref<64x32xf32, #tpu.memory_space<vmem>>, %arg8: memref<1x32xf32, #tpu.memory_space<vmem>>, %arg9: memref<1x32xf32, #tpu.memory_space<vmem>>, %arg10: memref<1x32xf32, #tpu.memory_space<vmem>>, %arg11: memref<1x32xf32, #tpu.memory_space<vmem>>, %arg12: memref<1x32xf32, #tpu.memory_space<vmem>>, %arg13: memref<16x32xf32, #tpu.memory_space<vmem>>) attributes {dimension_semantics = [#tpu.dimension_semantics<parallel>], iteration_bounds = array<i64: 1>, scalar_prefetch = 0 : i64, scratch_operands = 0 : i64, tpu.core_type = #tpu.core_type<tc>, window_params = [{transform_indices = @transform_0, window_bounds = array<i64: 16, 32>}, {transform_indices = @transform_1, window_bounds = array<i64: 2, 1, 8>}, {pipeline_mode = #tpu.pipeline_mode<synchronous>, transform_indices = @transform_2, window_bounds = array<i64: 32, 96>}, {pipeline_mode = #tpu.pipeline_mode<synchronous>, transform_indices = @transform_3, window_bounds = array<i64: 8, 8, 32>}, {pipeline_mode = #tpu.pipeline_mode<synchronous>, transform_indices = @transform_4, window_bounds = array<i64: 32, 64>}, {pipeline_mode = #tpu.pipeline_mode<synchronous>, transform_indices = @transform_5, window_bounds = array<i64: 1, 64>}, {pipeline_mode = #tpu.pipeline_mode<synchronous>, transform_indices = @transform_6, window_bounds = array<i64: 64, 32>}, {pipeline_mode = #tpu.pipeline_mode<synchronous>, transform_indices = @transform_7, window_bounds = array<i64: 1, 32>}, {pipeline_mode = #tpu.pipeline_mode<synchronous>, transform_indices = @transform_8, window_bounds = array<i64: 1, 32>}, {pipeline_mode = #tpu.pipeline_mode<synchronous>, transform_indices = @transform_9, window_bounds = array<i64: 1, 32>}, {pipeline_mode = #tpu.pipeline_mode<synchronous>, transform_indices = @transform_10, window_bounds = array<i64: 1, 32>}, {pipeline_mode = #tpu.pipeline_mode<synchronous>, transform_indices = @transform_11, window_bounds = array<i64: 1, 32>}, {transform_indices = @transform_12, window_bounds = array<i64: 16, 32>}]} {
    %c0 = arith.constant 0 : index
    %c0_0 = arith.constant 0 : index
    %0 = vector.load %arg1[%c0, %c0_0] : memref<16x32xf32, #tpu.memory_space<vmem>>, vector<16x32xf32>
    %c0_1 = arith.constant 0 : index
    %c0_2 = arith.constant 0 : index
    %1 = vector.load %arg9[%c0_1, %c0_2] : memref<1x32xf32, #tpu.memory_space<vmem>>, vector<1x32xf32>
    %c0_3 = arith.constant 0 : index
    %c0_4 = arith.constant 0 : index
    %2 = vector.load %arg10[%c0_3, %c0_4] : memref<1x32xf32, #tpu.memory_space<vmem>>, vector<1x32xf32>
    %cst = arith.constant dense<0.000000e+00> : vector<16xf32>
    %3 = vector.multi_reduction <add>, %0, %cst [1] : vector<16x32xf32> to vector<16xf32>
    %4 = vector.shape_cast %3 : vector<16xf32> to vector<16x1xf32>
    %cst_5 = arith.constant 3.200000e+01 : f32
    %5 = vector.broadcast %cst_5 : f32 to vector<16x1xf32>
    %6 = arith.divf %4, %5 : vector<16x1xf32>
    %7 = vector.broadcast %6 : vector<16x1xf32> to vector<16x32xf32>
    %8 = arith.subf %0, %7 : vector<16x32xf32>
    %9 = arith.mulf %8, %8 : vector<16x32xf32>
    %cst_6 = arith.constant dense<0.000000e+00> : vector<16xf32>
    %10 = vector.multi_reduction <add>, %9, %cst_6 [1] : vector<16x32xf32> to vector<16xf32>
    %11 = vector.shape_cast %10 : vector<16xf32> to vector<16x1xf32>
    %cst_7 = arith.constant 0.0322580636 : f32
    %12 = vector.broadcast %cst_7 : f32 to vector<16x1xf32>
    %13 = arith.mulf %11, %12 : vector<16x1xf32>
    %14 = math.sqrt %13 : vector<16x1xf32>
    %cst_8 = arith.constant 9.99999997E-7 : f32
    %15 = vector.broadcast %cst_8 : f32 to vector<16x1xf32>
    %16 = arith.addf %14, %15 : vector<16x1xf32>
    %17 = tpu.reciprocal %16 {approx = true} : vector<16x1xf32> -> vector<16x1xf32>
    %18 = vector.broadcast %6 : vector<16x1xf32> to vector<16x32xf32>
    %19 = arith.subf %0, %18 : vector<16x32xf32>
    %20 = vector.broadcast %1 : vector<1x32xf32> to vector<16x32xf32>
    %21 = arith.mulf %20, %19 : vector<16x32xf32>
    %22 = vector.broadcast %17 : vector<16x1xf32> to vector<16x32xf32>
    %23 = arith.mulf %21, %22 : vector<16x32xf32>
    %24 = vector.broadcast %2 : vector<1x32xf32> to vector<16x32xf32>
    %25 = arith.addf %23, %24 : vector<16x32xf32>
    %c0_9 = arith.constant 0 : index
    %c0_10 = arith.constant 0 : index
    %26 = vector.load %arg3[%c0_9, %c0_10] : memref<32x96xf32, #tpu.memory_space<vmem>>, vector<32x96xf32>
    %cst_11 = arith.constant dense<0.000000e+00> : vector<16x96xf32>
    %27 = tpu.matmul %25, %26, %cst_11 {dimension_numbers = #tpu.dot_dimension_numbers<[1], [0], [0], [1], [0, 0, 1, 1], [], []>} : vector<16x32xf32>, vector<32x96xf32>, vector<16x96xf32> -> vector<16x96xf32>
    %28 = vector.extract_strided_slice %27 {offsets = [0, 0], sizes = [8, 8], strides = [1, 1]} : vector<16x96xf32> to vector<8x8xf32>
    %29 = vector.extract_strided_slice %27 {offsets = [0, 8], sizes = [8, 8], strides = [1, 1]} : vector<16x96xf32> to vector<8x8xf32>
    %30 = vector.extract_strided_slice %27 {offsets = [0, 16], sizes = [8, 8], strides = [1, 1]} : vector<16x96xf32> to vector<8x8xf32>
    %31 = vector.extract_strided_slice %27 {offsets = [0, 24], sizes = [8, 8], strides = [1, 1]} : vector<16x96xf32> to vector<8x8xf32>
    %32 = vector.extract_strided_slice %27 {offsets = [8, 0], sizes = [8, 8], strides = [1, 1]} : vector<16x96xf32> to vector<8x8xf32>
    %33 = vector.extract_strided_slice %27 {offsets = [8, 8], sizes = [8, 8], strides = [1, 1]} : vector<16x96xf32> to vector<8x8xf32>
    %34 = vector.extract_strided_slice %27 {offsets = [8, 16], sizes = [8, 8], strides = [1, 1]} : vector<16x96xf32> to vector<8x8xf32>
    %35 = vector.extract_strided_slice %27 {offsets = [8, 24], sizes = [8, 8], strides = [1, 1]} : vector<16x96xf32> to vector<8x8xf32>
    %36 = vector.shape_cast %28 : vector<8x8xf32> to vector<1x8x8xf32>
    %37 = vector.shape_cast %29 : vector<8x8xf32> to vector<1x8x8xf32>
    %38 = vector.shape_cast %30 : vector<8x8xf32> to vector<1x8x8xf32>
    %39 = vector.shape_cast %31 : vector<8x8xf32> to vector<1x8x8xf32>
    %40 = vector.shape_cast %32 : vector<8x8xf32> to vector<1x8x8xf32>
    %41 = vector.shape_cast %33 : vector<8x8xf32> to vector<1x8x8xf32>
    %42 = vector.shape_cast %34 : vector<8x8xf32> to vector<1x8x8xf32>
    %43 = vector.shape_cast %35 : vector<8x8xf32> to vector<1x8x8xf32>
    %44 = tpu.concatenate %36, %37, %38, %39, %40, %41, %42, %43 in 0 : vector<1x8x8xf32>, vector<1x8x8xf32>, vector<1x8x8xf32>, vector<1x8x8xf32>, vector<1x8x8xf32>, vector<1x8x8xf32>, vector<1x8x8xf32>, vector<1x8x8xf32> -> vector<8x8x8xf32>
    %45 = vector.extract_strided_slice %27 {offsets = [0, 32], sizes = [8, 8], strides = [1, 1]} : vector<16x96xf32> to vector<8x8xf32>
    %46 = vector.extract_strided_slice %27 {offsets = [0, 40], sizes = [8, 8], strides = [1, 1]} : vector<16x96xf32> to vector<8x8xf32>
    %47 = vector.extract_strided_slice %27 {offsets = [0, 48], sizes = [8, 8], strides = [1, 1]} : vector<16x96xf32> to vector<8x8xf32>
    %48 = vector.extract_strided_slice %27 {offsets = [0, 56], sizes = [8, 8], strides = [1, 1]} : vector<16x96xf32> to vector<8x8xf32>
    %49 = vector.extract_strided_slice %27 {offsets = [8, 32], sizes = [8, 8], strides = [1, 1]} : vector<16x96xf32> to vector<8x8xf32>
    %50 = vector.extract_strided_slice %27 {offsets = [8, 40], sizes = [8, 8], strides = [1, 1]} : vector<16x96xf32> to vector<8x8xf32>
    %51 = vector.extract_strided_slice %27 {offsets = [8, 48], sizes = [8, 8], strides = [1, 1]} : vector<16x96xf32> to vector<8x8xf32>
    %52 = vector.extract_strided_slice %27 {offsets = [8, 56], sizes = [8, 8], strides = [1, 1]} : vector<16x96xf32> to vector<8x8xf32>
    %53 = vector.shape_cast %45 : vector<8x8xf32> to vector<1x8x8xf32>
    %54 = vector.shape_cast %46 : vector<8x8xf32> to vector<1x8x8xf32>
    %55 = vector.shape_cast %47 : vector<8x8xf32> to vector<1x8x8xf32>
    %56 = vector.shape_cast %48 : vector<8x8xf32> to vector<1x8x8xf32>
    %57 = vector.shape_cast %49 : vector<8x8xf32> to vector<1x8x8xf32>
    %58 = vector.shape_cast %50 : vector<8x8xf32> to vector<1x8x8xf32>
    %59 = vector.shape_cast %51 : vector<8x8xf32> to vector<1x8x8xf32>
    %60 = vector.shape_cast %52 : vector<8x8xf32> to vector<1x8x8xf32>
    %61 = tpu.concatenate %53, %54, %55, %56, %57, %58, %59, %60 in 0 : vector<1x8x8xf32>, vector<1x8x8xf32>, vector<1x8x8xf32>, vector<1x8x8xf32>, vector<1x8x8xf32>, vector<1x8x8xf32>, vector<1x8x8xf32>, vector<1x8x8xf32> -> vector<8x8x8xf32>
    %62 = vector.extract_strided_slice %27 {offsets = [0, 64], sizes = [8, 8], strides = [1, 1]} : vector<16x96xf32> to vector<8x8xf32>
    %63 = vector.extract_strided_slice %27 {offsets = [0, 72], sizes = [8, 8], strides = [1, 1]} : vector<16x96xf32> to vector<8x8xf32>
    %64 = vector.extract_strided_slice %27 {offsets = [0, 80], sizes = [8, 8], strides = [1, 1]} : vector<16x96xf32> to vector<8x8xf32>
    %65 = vector.extract_strided_slice %27 {offsets = [0, 88], sizes = [8, 8], strides = [1, 1]} : vector<16x96xf32> to vector<8x8xf32>
    %66 = vector.extract_strided_slice %27 {offsets = [8, 64], sizes = [8, 8], strides = [1, 1]} : vector<16x96xf32> to vector<8x8xf32>
    %67 = vector.extract_strided_slice %27 {offsets = [8, 72], sizes = [8, 8], strides = [1, 1]} : vector<16x96xf32> to vector<8x8xf32>
    %68 = vector.extract_strided_slice %27 {offsets = [8, 80], sizes = [8, 8], strides = [1, 1]} : vector<16x96xf32> to vector<8x8xf32>
    %69 = vector.extract_strided_slice %27 {offsets = [8, 88], sizes = [8, 8], strides = [1, 1]} : vector<16x96xf32> to vector<8x8xf32>
    %70 = vector.shape_cast %62 : vector<8x8xf32> to vector<1x8x8xf32>
    %71 = vector.shape_cast %63 : vector<8x8xf32> to vector<1x8x8xf32>
    %72 = vector.shape_cast %64 : vector<8x8xf32> to vector<1x8x8xf32>
    %73 = vector.shape_cast %65 : vector<8x8xf32> to vector<1x8x8xf32>
    %74 = vector.shape_cast %66 : vector<8x8xf32> to vector<1x8x8xf32>
    %75 = vector.shape_cast %67 : vector<8x8xf32> to vector<1x8x8xf32>
    %76 = vector.shape_cast %68 : vector<8x8xf32> to vector<1x8x8xf32>
    %77 = vector.shape_cast %69 : vector<8x8xf32> to vector<1x8x8xf32>
    %78 = tpu.concatenate %70, %71, %72, %73, %74, %75, %76, %77 in 0 : vector<1x8x8xf32>, vector<1x8x8xf32>, vector<1x8x8xf32>, vector<1x8x8xf32>, vector<1x8x8xf32>, vector<1x8x8xf32>, vector<1x8x8xf32>, vector<1x8x8xf32> -> vector<8x8x8xf32>
    %c0_12 = arith.constant 0 : index
    %c0_13 = arith.constant 0 : index
    %c0_14 = arith.constant 0 : index
    %79 = vector.load %arg2[%c0_12, %c0_13, %c0_14] : memref<2x1x8xf32, #tpu.memory_space<vmem>>, vector<1x1x8xf32>
    %80 = vector.shape_cast %79 : vector<1x1x8xf32> to vector<1x8xf32>
    %c0_15 = arith.constant 0 : index
    %c0_16 = arith.constant 0 : index
    %c0_17 = arith.constant 0 : index
    %81 = vector.load %arg2[%c0_15, %c0_16, %c0_17] : memref<2x1x8xf32, #tpu.memory_space<vmem>>, vector<1x1x8xf32>
    %82 = vector.shape_cast %81 : vector<1x1x8xf32> to vector<1x8xf32>
    %c0_18 = arith.constant 0 : index
    %c0_19 = arith.constant 0 : index
    %c0_20 = arith.constant 0 : index
    %83 = vector.load %arg2[%c0_18, %c0_19, %c0_20] : memref<2x1x8xf32, #tpu.memory_space<vmem>>, vector<1x1x8xf32>
    %84 = vector.shape_cast %83 : vector<1x1x8xf32> to vector<1x8xf32>
    %c0_21 = arith.constant 0 : index
    %c0_22 = arith.constant 0 : index
    %c0_23 = arith.constant 0 : index
    %85 = vector.load %arg2[%c0_21, %c0_22, %c0_23] : memref<2x1x8xf32, #tpu.memory_space<vmem>>, vector<1x1x8xf32>
    %86 = vector.shape_cast %85 : vector<1x1x8xf32> to vector<1x8xf32>
    %c1 = arith.constant 1 : index
    %c0_24 = arith.constant 0 : index
    %c0_25 = arith.constant 0 : index
    %87 = vector.load %arg2[%c1, %c0_24, %c0_25] : memref<2x1x8xf32, #tpu.memory_space<vmem>>, vector<1x1x8xf32>
    %88 = vector.shape_cast %87 : vector<1x1x8xf32> to vector<1x8xf32>
    %c1_26 = arith.constant 1 : index
    %c0_27 = arith.constant 0 : index
    %c0_28 = arith.constant 0 : index
    %89 = vector.load %arg2[%c1_26, %c0_27, %c0_28] : memref<2x1x8xf32, #tpu.memory_space<vmem>>, vector<1x1x8xf32>
    %90 = vector.shape_cast %89 : vector<1x1x8xf32> to vector<1x8xf32>
    %c1_29 = arith.constant 1 : index
    %c0_30 = arith.constant 0 : index
    %c0_31 = arith.constant 0 : index
    %91 = vector.load %arg2[%c1_29, %c0_30, %c0_31] : memref<2x1x8xf32, #tpu.memory_space<vmem>>, vector<1x1x8xf32>
    %92 = vector.shape_cast %91 : vector<1x1x8xf32> to vector<1x8xf32>
    %c1_32 = arith.constant 1 : index
    %c0_33 = arith.constant 0 : index
    %c0_34 = arith.constant 0 : index
    %93 = vector.load %arg2[%c1_32, %c0_33, %c0_34] : memref<2x1x8xf32, #tpu.memory_space<vmem>>, vector<1x1x8xf32>
    %94 = vector.shape_cast %93 : vector<1x1x8xf32> to vector<1x8xf32>
    %95 = vector.shape_cast %80 : vector<1x8xf32> to vector<1x1x8xf32>
    %96 = vector.shape_cast %82 : vector<1x8xf32> to vector<1x1x8xf32>
    %97 = vector.shape_cast %84 : vector<1x8xf32> to vector<1x1x8xf32>
    %98 = vector.shape_cast %86 : vector<1x8xf32> to vector<1x1x8xf32>
    %99 = vector.shape_cast %88 : vector<1x8xf32> to vector<1x1x8xf32>
    %100 = vector.shape_cast %90 : vector<1x8xf32> to vector<1x1x8xf32>
    %101 = vector.shape_cast %92 : vector<1x8xf32> to vector<1x1x8xf32>
    %102 = vector.shape_cast %94 : vector<1x8xf32> to vector<1x1x8xf32>
    %103 = tpu.concatenate %95, %96, %97, %98, %99, %100, %101, %102 in 0 : vector<1x1x8xf32>, vector<1x1x8xf32>, vector<1x1x8xf32>, vector<1x1x8xf32>, vector<1x1x8xf32>, vector<1x1x8xf32>, vector<1x1x8xf32>, vector<1x1x8xf32> -> vector<8x1x8xf32>
    %cst_35 = arith.constant 1.000000e+00 : f32
    %104 = vector.broadcast %cst_35 : f32 to vector<8x1x8xf32>
    %105 = arith.cmpf oeq, %103, %104 : vector<8x1x8xf32>
    "tpu.trace_start"() <{level = 10 : i32, message = "nqd,nkd->nqk"}> : () -> ()
    %cst_36 = arith.constant dense<0.000000e+00> : vector<8x8x8xf32>
    %106 = tpu.matmul %44, %61, %cst_36 {dimension_numbers = #tpu.dot_dimension_numbers<[2], [2], [1], [1], [0, 0, 0, 1, 1, 1], [0], [0]>} : vector<8x8x8xf32>, vector<8x8x8xf32>, vector<8x8x8xf32> -> vector<8x8x8xf32>
    %cst_37 = arith.constant -1.000000e+09 : f32
    "tpu.trace_stop"() : () -> ()
    %107 = vector.shape_cast %105 : vector<8x1x8xi1> to vector<8x1x8xi1>
    %108 = vector.broadcast %107 : vector<8x1x8xi1> to vector<8x8x8xi1>
    %109 = vector.broadcast %cst_37 : f32 to vector<8x8x8xf32>
    %110 = arith.select %108, %109, %106 : vector<8x8x8xi1>, vector<8x8x8xf32>
    %cst_38 = arith.constant dense<0xFF800000> : vector<8x8xf32>
    %111 = vector.multi_reduction <maximumf>, %110, %cst_38 [2] : vector<8x8x8xf32> to vector<8x8xf32>
    %112 = vector.shape_cast %111 : vector<8x8xf32> to vector<8x8x1xf32>
    %113 = vector.broadcast %112 : vector<8x8x1xf32> to vector<8x8x8xf32>
    %114 = arith.subf %110, %113 : vector<8x8x8xf32>
    %115 = math.exp %114 : vector<8x8x8xf32>
    %cst_39 = arith.constant dense<0.000000e+00> : vector<8x8xf32>
    %116 = vector.multi_reduction <add>, %115, %cst_39 [2] : vector<8x8x8xf32> to vector<8x8xf32>
    %117 = vector.shape_cast %116 : vector<8x8xf32> to vector<8x8x1xf32>
    %118 = tpu.reciprocal %117 {approx = true} : vector<8x8x1xf32> -> vector<8x8x1xf32>
    %119 = vector.broadcast %118 : vector<8x8x1xf32> to vector<8x8x8xf32>
    %120 = arith.mulf %115, %119 : vector<8x8x8xf32>
    "tpu.trace_start"() <{level = 10 : i32, message = "nqk,nkd->nqd"}> : () -> ()
    %cst_40 = arith.constant dense<0.000000e+00> : vector<8x8x8xf32>
    %121 = tpu.matmul %120, %78, %cst_40 {dimension_numbers = #tpu.dot_dimension_numbers<[2], [1], [1], [2], [0, 0, 0, 1, 1, 2], [0], [0]>} : vector<8x8x8xf32>, vector<8x8x8xf32>, vector<8x8x8xf32> -> vector<8x8x8xf32>
    "tpu.trace_stop"() : () -> ()
    %c0_41 = arith.constant 0 : index
    %c0_42 = arith.constant 0 : index
    %c0_43 = arith.constant 0 : index
    %122 = vector.load %arg4[%c0_41, %c0_42, %c0_43] : memref<8x8x32xf32, #tpu.memory_space<vmem>>, vector<8x8x32xf32>
    "tpu.trace_start"() <{level = 10 : i32, message = "nqd,ndm->nqm"}> : () -> ()
    %cst_44 = arith.constant dense<0.000000e+00> : vector<8x8x32xf32>
    %123 = tpu.matmul %121, %122, %cst_44 {dimension_numbers = #tpu.dot_dimension_numbers<[2], [1], [1], [2], [0, 0, 0, 1, 1, 2], [0], [0]>} : vector<8x8x8xf32>, vector<8x8x32xf32>, vector<8x8x32xf32> -> vector<8x8x32xf32>
    "tpu.trace_stop"() : () -> ()
    %124 = vector.extract_strided_slice %123 {offsets = [0, 0, 0], sizes = [1, 8, 32], strides = [1, 1, 1]} : vector<8x8x32xf32> to vector<1x8x32xf32>
    %125 = vector.shape_cast %124 : vector<1x8x32xf32> to vector<8x32xf32>
    %126 = vector.extract_strided_slice %123 {offsets = [1, 0, 0], sizes = [1, 8, 32], strides = [1, 1, 1]} : vector<8x8x32xf32> to vector<1x8x32xf32>
    %127 = vector.shape_cast %126 : vector<1x8x32xf32> to vector<8x32xf32>
    %128 = arith.addf %125, %127 : vector<8x32xf32>
    %129 = vector.extract_strided_slice %123 {offsets = [2, 0, 0], sizes = [1, 8, 32], strides = [1, 1, 1]} : vector<8x8x32xf32> to vector<1x8x32xf32>
    %130 = vector.shape_cast %129 : vector<1x8x32xf32> to vector<8x32xf32>
    %131 = arith.addf %128, %130 : vector<8x32xf32>
    %132 = vector.extract_strided_slice %123 {offsets = [3, 0, 0], sizes = [1, 8, 32], strides = [1, 1, 1]} : vector<8x8x32xf32> to vector<1x8x32xf32>
    %133 = vector.shape_cast %132 : vector<1x8x32xf32> to vector<8x32xf32>
    %134 = arith.addf %131, %133 : vector<8x32xf32>
    %135 = vector.extract_strided_slice %123 {offsets = [4, 0, 0], sizes = [1, 8, 32], strides = [1, 1, 1]} : vector<8x8x32xf32> to vector<1x8x32xf32>
    %136 = vector.shape_cast %135 : vector<1x8x32xf32> to vector<8x32xf32>
    %137 = vector.extract_strided_slice %123 {offsets = [5, 0, 0], sizes = [1, 8, 32], strides = [1, 1, 1]} : vector<8x8x32xf32> to vector<1x8x32xf32>
    %138 = vector.shape_cast %137 : vector<1x8x32xf32> to vector<8x32xf32>
    %139 = arith.addf %136, %138 : vector<8x32xf32>
    %140 = vector.extract_strided_slice %123 {offsets = [6, 0, 0], sizes = [1, 8, 32], strides = [1, 1, 1]} : vector<8x8x32xf32> to vector<1x8x32xf32>
    %141 = vector.shape_cast %140 : vector<1x8x32xf32> to vector<8x32xf32>
    %142 = arith.addf %139, %141 : vector<8x32xf32>
    %143 = vector.extract_strided_slice %123 {offsets = [7, 0, 0], sizes = [1, 8, 32], strides = [1, 1, 1]} : vector<8x8x32xf32> to vector<1x8x32xf32>
    %144 = vector.shape_cast %143 : vector<1x8x32xf32> to vector<8x32xf32>
    %145 = arith.addf %142, %144 : vector<8x32xf32>
    %146 = tpu.concatenate %134, %145 in 0 : vector<8x32xf32>, vector<8x32xf32> -> vector<16x32xf32>
    %147 = arith.addf %0, %146 : vector<16x32xf32>
    %c0_45 = arith.constant 0 : index
    %c0_46 = arith.constant 0 : index
    %148 = vector.load %arg11[%c0_45, %c0_46] : memref<1x32xf32, #tpu.memory_space<vmem>>, vector<1x32xf32>
    %c0_47 = arith.constant 0 : index
    %c0_48 = arith.constant 0 : index
    %149 = vector.load %arg12[%c0_47, %c0_48] : memref<1x32xf32, #tpu.memory_space<vmem>>, vector<1x32xf32>
    %cst_49 = arith.constant dense<0.000000e+00> : vector<16xf32>
    %150 = vector.multi_reduction <add>, %147, %cst_49 [1] : vector<16x32xf32> to vector<16xf32>
    %151 = vector.shape_cast %150 : vector<16xf32> to vector<16x1xf32>
    %cst_50 = arith.constant 3.200000e+01 : f32
    %152 = vector.broadcast %cst_50 : f32 to vector<16x1xf32>
    %153 = arith.divf %151, %152 : vector<16x1xf32>
    %154 = vector.broadcast %153 : vector<16x1xf32> to vector<16x32xf32>
    %155 = arith.subf %147, %154 : vector<16x32xf32>
    %156 = arith.mulf %155, %155 : vector<16x32xf32>
    %cst_51 = arith.constant dense<0.000000e+00> : vector<16xf32>
    %157 = vector.multi_reduction <add>, %156, %cst_51 [1] : vector<16x32xf32> to vector<16xf32>
    %158 = vector.shape_cast %157 : vector<16xf32> to vector<16x1xf32>
    %cst_52 = arith.constant 0.0322580636 : f32
    %159 = vector.broadcast %cst_52 : f32 to vector<16x1xf32>
    %160 = arith.mulf %158, %159 : vector<16x1xf32>
    %161 = math.sqrt %160 : vector<16x1xf32>
    %cst_53 = arith.constant 9.99999997E-7 : f32
    %162 = vector.broadcast %cst_53 : f32 to vector<16x1xf32>
    %163 = arith.addf %161, %162 : vector<16x1xf32>
    %164 = tpu.reciprocal %163 {approx = true} : vector<16x1xf32> -> vector<16x1xf32>
    %165 = vector.broadcast %153 : vector<16x1xf32> to vector<16x32xf32>
    %166 = arith.subf %147, %165 : vector<16x32xf32>
    %167 = vector.broadcast %148 : vector<1x32xf32> to vector<16x32xf32>
    %168 = arith.mulf %167, %166 : vector<16x32xf32>
    %169 = vector.broadcast %164 : vector<16x1xf32> to vector<16x32xf32>
    %170 = arith.mulf %168, %169 : vector<16x32xf32>
    %171 = vector.broadcast %149 : vector<1x32xf32> to vector<16x32xf32>
    %172 = arith.addf %170, %171 : vector<16x32xf32>
    %c0_54 = arith.constant 0 : index
    %c0_55 = arith.constant 0 : index
    %173 = vector.load %arg5[%c0_54, %c0_55] : memref<32x64xf32, #tpu.memory_space<vmem>>, vector<32x64xf32>
    %cst_56 = arith.constant dense<0.000000e+00> : vector<16x64xf32>
    %174 = tpu.matmul %172, %173, %cst_56 {dimension_numbers = #tpu.dot_dimension_numbers<[1], [0], [0], [1], [0, 0, 1, 1], [], []>} : vector<16x32xf32>, vector<32x64xf32>, vector<16x64xf32> -> vector<16x64xf32>
    %c0_57 = arith.constant 0 : index
    %c0_58 = arith.constant 0 : index
    %175 = vector.load %arg6[%c0_57, %c0_58] : memref<1x64xf32, #tpu.memory_space<vmem>>, vector<1x64xf32>
    %176 = vector.broadcast %175 : vector<1x64xf32> to vector<16x64xf32>
    %177 = arith.addf %174, %176 : vector<16x64xf32>
    %cst_59 = arith.constant 0.000000e+00 : f32
    %178 = vector.broadcast %cst_59 : f32 to vector<16x64xf32>
    %179 = arith.maximumf %177, %178 : vector<16x64xf32>
    %c0_60 = arith.constant 0 : index
    %c0_61 = arith.constant 0 : index
    %180 = vector.load %arg7[%c0_60, %c0_61] : memref<64x32xf32, #tpu.memory_space<vmem>>, vector<64x32xf32>
    %cst_62 = arith.constant dense<0.000000e+00> : vector<16x32xf32>
    %181 = tpu.matmul %179, %180, %cst_62 {dimension_numbers = #tpu.dot_dimension_numbers<[1], [0], [0], [1], [0, 0, 1, 1], [], []>} : vector<16x64xf32>, vector<64x32xf32>, vector<16x32xf32> -> vector<16x32xf32>
    %c0_63 = arith.constant 0 : index
    %c0_64 = arith.constant 0 : index
    %182 = vector.load %arg8[%c0_63, %c0_64] : memref<1x32xf32, #tpu.memory_space<vmem>>, vector<1x32xf32>
    %183 = vector.broadcast %182 : vector<1x32xf32> to vector<16x32xf32>
    %184 = arith.addf %181, %183 : vector<16x32xf32>
    %185 = arith.addf %147, %184 : vector<16x32xf32>
    %c0_65 = arith.constant 0 : index
    %c0_66 = arith.constant 0 : index
    %186 = vector.load %arg13[%c0_65, %c0_66] : memref<16x32xf32, #tpu.memory_space<vmem>>, vector<16x32xf32>
    tpu.vector_store %arg13[%c0_65, %c0_66], %185 {strides = array<i32>} : memref<16x32xf32, #tpu.memory_space<vmem>>, vector<16x32xf32>,
    return
  }
  func.func @transform_0(%arg0: i32) -> (i32, i32) {
    %c0_i32 = arith.constant 0 : i32
    %c0_i32_0 = arith.constant 0 : i32
    return %arg0, %c0_i32 : i32, i32
  }
  func.func @transform_1(%arg0: i32) -> (i32, i32, i32) {
    %c0_i32 = arith.constant 0 : i32
    %c0_i32_0 = arith.constant 0 : i32
    %c0_i32_1 = arith.constant 0 : i32
    return %arg0, %c0_i32, %c0_i32_0 : i32, i32, i32
  }
  func.func @transform_2(%arg0: i32) -> (i32, i32) {
    %c0_i32 = arith.constant 0 : i32
    %c0_i32_0 = arith.constant 0 : i32
    %c0_i32_1 = arith.constant 0 : i32
    return %c0_i32, %c0_i32_0 : i32, i32
  }
  func.func @transform_3(%arg0: i32) -> (i32, i32, i32) {
    %c0_i32 = arith.constant 0 : i32
    %c0_i32_0 = arith.constant 0 : i32
    %c0_i32_1 = arith.constant 0 : i32
    %c0_i32_2 = arith.constant 0 : i32
    return %c0_i32, %c0_i32_0, %c0_i32_1 : i32, i32, i32
  }
  func.func @transform_4(%arg0: i32) -> (i32, i32) {
    %c0_i32 = arith.constant 0 : i32
    %c0_i32_0 = arith.constant 0 : i32
    %c0_i32_1 = arith.constant 0 : i32
    return %c0_i32, %c0_i32_0 : i32, i32
  }
  func.func @transform_5(%arg0: i32) -> (i32, i32) {
    %c0_i32 = arith.constant 0 : i32
    %c0_i32_0 = arith.constant 0 : i32
    %c0_i32_1 = arith.constant 0 : i32
    return %c0_i32, %c0_i32_0 : i32, i32
  }
  func.func @transform_6(%arg0: i32) -> (i32, i32) {
    %c0_i32 = arith.constant 0 : i32
    %c0_i32_0 = arith.constant 0 : i32
    %c0_i32_1 = arith.constant 0 : i32
    return %c0_i32, %c0_i32_0 : i32, i32
  }
  func.func @transform_7(%arg0: i32) -> (i32, i32) {
    %c0_i32 = arith.constant 0 : i32
    %c0_i32_0 = arith.constant 0 : i32
    %c0_i32_1 = arith.constant 0 : i32
    return %c0_i32, %c0_i32_0 : i32, i32
  }
  func.func @transform_8(%arg0: i32) -> (i32, i32) {
    %c0_i32 = arith.constant 0 : i32
    %c0_i32_0 = arith.constant 0 : i32
    %c0_i32_1 = arith.constant 0 : i32
    return %c0_i32, %c0_i32_0 : i32, i32
  }
  func.func @transform_9(%arg0: i32) -> (i32, i32) {
    %c0_i32 = arith.constant 0 : i32
    %c0_i32_0 = arith.constant 0 : i32
    %c0_i32_1 = arith.constant 0 : i32
    return %c0_i32, %c0_i32_0 : i32, i32
  }
  func.func @transform_10(%arg0: i32) -> (i32, i32) {
    %c0_i32 = arith.constant 0 : i32
    %c0_i32_0 = arith.constant 0 : i32
    %c0_i32_1 = arith.constant 0 : i32
    return %c0_i32, %c0_i32_0 : i32, i32
  }
  func.func @transform_11(%arg0: i32) -> (i32, i32) {
    %c0_i32 = arith.constant 0 : i32
    %c0_i32_0 = arith.constant 0 : i32
    %c0_i32_1 = arith.constant 0 : i32
    return %c0_i32, %c0_i32_0 : i32, i32
  }
  func.func @transform_12(%arg0: i32) -> (i32, i32) {
    %c0_i32 = arith.constant 0 : i32
    %c0_i32_0 = arith.constant 0 : i32
    return %arg0, %c0_i32 : i32, i32
  }
}

</mosaic_0001>

<bundles_post_ra>
// kernel: tpu_custom_call.1
= control target key start
LH: loop header
LB: loop body
LE: loop exit
PB: predicated region body
PF: predicated region fallthrough
CT: control target
= control target key end

     0   :  { %17 = vsyncpa [#allocation3], 0  ;;  %s3243_s0 = inlined_call_operand.hbm [shape: f32[16,32], index: 0, kind: input, shape index: {}]   ;;  %s3244_s1 = inlined_call_operand.vmem [shape: f32[2,1,8], index: 1, kind: input, shape index: {}]   ;;  %s3245_s2 = inlined_call_operand.vmem [shape: f32[32,96], index: 2, kind: input, shape index: {}]   ;;  %s3246_s3 = inlined_call_operand.vmem [shape: f32[8,8,32], index: 3, kind: input, shape index: {}]   ;;  %s3247_s4 = inlined_call_operand.hbm [shape: f32[32,64], index: 4, kind: input, shape index: {}]   ;;  %s3248_s5 = inlined_call_operand.vmem [shape: f32[1,64], index: 5, kind: input, shape index: {}]   ;;  %s3249_s6 = inlined_call_operand.vmem [shape: f32[64,32], index: 6, kind: input, shape index: {}]   ;;  %s3250_s7 = inlined_call_operand.vmem [shape: f32[1,32], index: 7, kind: input, shape index: {}]   ;;  %s3251_s8 = inlined_call_operand.vmem [shape: f32[1,32], index: 8, kind: input, shape index: {}]   ;;  %s3252_s9 = inlined_call_operand.vmem [shape: f32[1,32], index: 9, kind: input, shape index: {}]   ;;  %s3253_s10 = inlined_call_operand.vmem [shape: f32[1,32], index: 10, kind: input, shape index: {}]   ;;  %s3254_s11 = inlined_call_operand.vmem [shape: f32[1,32], index: 11, kind: input, shape index: {}]   ;;  %s3255_s12 = inlined_call_operand.hbm [shape: f32[16,32], index: 12, kind: output, shape index: {}]  }
   0x1   :  { %18 = vsyncpa [#allocation6], 0 }
   0x2   :  { %19 = vsyncpa [#allocation4], 0  ;;  %s2835_s21 = smov [#allocation2]  }
   0x3   :  { %s25_s22 = sshll.u32 %s2835_s21, 4  ;;  %s26_s22 = int_to_ptr.vmem [resolvable:$true] %s25_s22 }
   0x4   :  { %s2777_s23 = scalar_lea.vmem %s26_s22, 256  ;;  %p2782_p1 = scmp.lt.s32.totalorder %s26_s22, %s26_s22 }
   0x5   :  { %p2778_p0 = scmp.ne.s32.totalorder %s26_s22, %s2777_s23  ;;  %p2783_p2 = scmp.lt.s32.totalorder %s2777_s23, %s2777_s23 }
   0x7   :  { %p2784_p3 = por %p2783_p2, %p2782_p1 }
   0x9   :  { %p2785_p4 = pnand %p2784_p3, %p2778_p0 }
   0xb   :  { %2788 = shalt.err (!%p2785_p4)
}
   0xc   :  { %s2836_s24 = smov 128   ;;  %s2837_s25 = smov 8  }
   0xd   :  { %31 = dma.hbm_to_vmem [thread:$0]  %s3243_s0, 256, %s26_s22, [#allocation3], %s2836_s24, %s2836_s24, %s2837_s25  }
   0xe   :  { %s2838_s28 = smov [#allocation5]  }
   0xf   :  { %s43_s29 = sshll.u32 %s2838_s28, 4  ;;  %s44_s29 = int_to_ptr.vmem [resolvable:$true] %s43_s29 }
  0x10   :  { %s2797_s30 = scalar_lea.vmem %s44_s29, 512  ;;  %p2802_p6 = scmp.lt.s32.totalorder %s44_s29, %s44_s29 }
  0x11   :  { %p2798_p5 = scmp.ne.s32.totalorder %s44_s29, %s2797_s30  ;;  %p2803_p7 = scmp.lt.s32.totalorder %s2797_s30, %s2797_s30 }
  0x13   :  { %p2804_p8 = por %p2803_p7, %p2802_p6 }
  0x15   :  { %p2805_p9 = pnand %p2804_p8, %p2798_p5 }
  0x17   :  { %2808 = shalt.err (!%p2805_p9)
}
  0x18   :  { %49 = dma.hbm_to_vmem [thread:$0]  %s3247_s4, 512, %s44_s29, [#allocation6], %s2836_s24, %s2836_s24, %s2837_s25  }
  0x19   :  { %2829 = dma.done.wait [#allocation3], 256  }
  0x1a   :  { %2830 = vsyncadd [#allocation3], 4294967040 }
  0x1b   :  { %2831 = dma.done.wait [#allocation6], 512  }
  0x1c   :  { %2832 = vsyncadd [#allocation6], 4294966784  ;;  %vm74_vm0 = vcmask 261120   ;;  %v2925_v0 = vld [vmem:[#allocation2] sm:$0xff]  ;;  %v2927_v1 = vld [vmem:[#allocation2 + $0x8] sm:$0xff]  ;;  %v2839_v44 = vmov 0.0   ;;  %v847_v61 = vlaneseq }
  0x1d   :  { %v75_v2 = vsel %vm74_vm0, %v2925_v0, 0.0  ;;  %v78_v3 = vsel %vm74_vm0, %v2927_v1, 0.0  ;;  %v135_v14 = vld [vmem:[%s3245_s2 + $0x18] sm:$0xff]  ;;  %v134_v15 = vld [vmem:[%s3245_s2 + $0x10] sm:$0xff]  ;;  %v133_v16 = vld [vmem:[%s3245_s2 + $0x8] sm:$0xff]  ;;  %2563 = vmatprep.subr.mxu1 %v2839_v44  ;;  %vm2840_vm5 = vmmov 0  }
  0x1e   :  { %76 = vadd.xlane.f32.xlu0 %v75_v2  ;;  %2547 = vmatprep.subr.mxu0 %v135_v14  ;;  %v132_v17 = vld [vmem:[%s3245_s2] sm:$0xff]  ;;  %s2843_s26 = smov 104   ;;  %s2844_s27 = smov 96   ;;  %vm238_vm6 = vcmask 64512   ;;  %v848_v63 = vshrl.u32 %v847_v61, 7  ;;  %vm2328_vm15 = vcmask 523264  }
  0x1f   :  { %2548 = vmatpush3.msra.mxu0 %v135_v14  ;;  %v2432_v34 = vld [vmem:[%s3251_s8] ss:$0 sm:$0xff]  ;;  %2565 = vmatprep.mubr.msk.f32.mxu1 %vm2840_vm5, %v2839_v44  ;;  %s2841_s8 = smov 112  }
  0x20   :  { %2549 = vmatprep.subr.mxu0 %v134_v15  ;;  %v2433_v37 = vld [vmem:[%s3252_s9] ss:$0 sm:$0xff]  ;;  %s2842_s9 = smov 120   ;;  %v849_v2 = vsub.s32 0, %v848_v63 }
  0x21   :  { %2550 = vmatpush3.msra.mxu0 %v134_v15  ;;  %v231_v62 = vld [vmem:[%s3244_s1] sm:$0x1] }
  0x22   :  { %79 = vadd.xlane.f32.xlu0 %v78_v3  ;;  %2551 = vmatprep.subr.mxu0 %v133_v16  ;;  %vm234_vm7 = vcmp.eq.f32.partialorder %v231_v62, 1.0  ;;  %v2845_v3 = vmov 0  }
  0x23   :  { %2552 = vmatpush3.msra.mxu0 %v133_v16 }
  0x24   :  { %2553 = vmatprep.subr.mxu0 %v132_v17 }
  0x25   :  { %2554 = vmatpush3.msra.mxu0 %v132_v17 }
  0x26   :  { %2558 = vmatprep.subr.mxu0 %v2839_v44 }
  0xa7   :  { %v77_v4 = vpop.xlane.xlu0 %76 }
  0xa8   :  { %v82_v5 = vmul.f32 0.03125, %v77_v4  ;;  %v845_v4 = vsel %vm234_vm7, 1, %v2845_v3 }
  0xaa   :  { %v84_v6 = vsub.f32 %v2925_v0, %v82_v5  ;;  %v850_v5 = vrot.slane %v845_v4, %v849_v2 }
  0xab   :  { %v80_v7 = vpop.xlane.xlu0 %79 }
  0xac   :  { %v83_v8 = vmul.f32 0.03125, %v80_v7  ;;  %v86_v9 = vmul.f32 %v84_v6, %v84_v6  ;;  %v120_v35 = vmul.f32 %v2432_v34, %v84_v6  ;;  %vm855_vm8 = vcmp.eq.s32.totalorder %v850_v5, 1 }
  0xae   :  { %v85_v10 = vsub.f32 %v2927_v1, %v83_v8  ;;  %v88_v11 = vsel %vm74_vm0, %v86_v9, 0.0 }
  0xaf   :  { %89 = vadd.xlane.f32.xlu1 %v88_v11 }
  0xb0   :  { %v87_v12 = vmul.f32 %v85_v10, %v85_v10  ;;  %v121_v39 = vmul.f32 %v2432_v34, %v85_v10  ;;  %v2436_v10 = vld [vmem:[%s3244_s1 + $0x1] sm:$0x1]  ;;  %s2846_s1 = smov 64  }
  0xb1   :  { %vm235_vm9 = vcmp.eq.f32.partialorder %v2436_v10, 1.0 }
  0xb2   :  { %v91_v13 = vsel %vm74_vm0, %v87_v12, 0.0  ;;  %v846_v11 = vsel %vm235_vm9, 1, %v2845_v3 }
  0xb3   :  { %92 = vadd.xlane.f32.xlu1 %v91_v13  ;;  %v854_v14 = vrot.slane %v846_v11, %v849_v2 }
  0xb5   :  { %vm856_vm10 = vcmp.eq.s32.totalorder %v854_v14, 1 }
 0x138   :  { %v90_v18 = vpop.xlane.xlu1 %89 }
 0x139   :  { %v94_v19 = vmul.f32 0.032258064, %v90_v18 }
 0x13b   :  { %2721 = vrsqrt.f32 %v94_v19  ;;  %vm98_vm1 = vcmp.eq.f32.partialorder %v94_v19, inf  ;;  %v101_v24 = vand.u32 2147483648, %v94_v19  ;;  %vm100_vm2 = vcmp.eq.f32.partialorder %v94_v19, 0.0 }
 0x13c   :  { %v93_v20 = vpop.xlane.xlu1 %92 }
 0x13d   :  { %v95_v21 = vmul.f32 0.032258064, %v93_v20 }
 0x13f   :  { %2723 = vrsqrt.f32 %v95_v21  ;;  %vm105_vm3 = vcmp.eq.f32.partialorder %v95_v21, inf  ;;  %v108_v30 = vand.u32 2147483648, %v95_v21  ;;  %vm107_vm4 = vcmp.eq.f32.partialorder %v95_v21, 0.0 }
 0x148   :  { %v2722_v22 = vpop.eup %2721 }
 0x149   :  { %v97_v23 = vmul.f32 %v2722_v22, %v94_v19 }
 0x14b   :  { %v99_v25 = vsel %vm98_vm1, %v94_v19, %v97_v23 }
 0x14c   :  { %v2724_v26 = vpop.eup %2723  ;;  %v102_v27 = vsel %vm100_vm2, %v101_v24, %v99_v25 }
 0x14d   :  { %v104_v28 = vmul.f32 %v2724_v26, %v95_v21  ;;  %v110_v29 = vadd.f32 1e-06, %v102_v27 }
 0x14f   :  { %v106_v31 = vsel %vm105_vm3, %v95_v21, %v104_v28  ;;  %2725 = vrcp.f32 %v110_v29 }
 0x150   :  { %v109_v32 = vsel %vm107_vm4, %v108_v30, %v106_v31 }
 0x151   :  { %v111_v33 = vadd.f32 1e-06, %v109_v32 }
 0x153   :  { %2727 = vrcp.f32 %v111_v33 }
 0x15c   :  { %v2726_v36 = vpop.eup %2725 }
 0x15d   :  { %v122_v38 = vmul.f32 %v2726_v36, %v120_v35 }
 0x15f   :  { %v130_v40 = vadd.f32 %v2433_v37, %v122_v38 }
 0x160   :  { %v2728_v41 = vpop.eup %2727 }
 0x161   :  { %v123_v42 = vmul.f32 %v2728_v41, %v121_v39  ;;  %2555 = vmatprep.mubr.msk.f32.mxu0 %vm74_vm0, %v130_v40 }
 0x163   :  { %v131_v43 = vadd.f32 %v2433_v37, %v123_v42 }
 0x165   :  { %2556 = vmatmul.mubr.msk.f32.vlgmr.msra.gmra.mxu0 %vm74_vm0, %v131_v43 }
 0x166   :  { %2560 = vmatprep.mubr.msk.f32.mxu0 %vm2840_vm5, %v2839_v44 }
 0x225   :  { %v2959_v45 = vpop.f32.mrf.mxu0 }
 0x227   :  { %v2965_v46 = vpop.f32.mrf.mxu0 }
 0x228   :  { %220 = vrot.lane.b32.xlu1 %v2965_v46, %s2841_s8  ;;  %218 = vrot.lane.b32.xlu0 %v2965_v46, %s2842_s9 }
 0x22c   :  { %222 = vrot.lane.b32.xlu1 %v2965_v46, %s2843_s26  ;;  %227 = vrot.lane.b32.xlu0 %v2959_v45, %s2841_s8 }
 0x230   :  { %225 = vrot.lane.b32.xlu1 %v2959_v45, %s2842_s9  ;;  %236 = vrot.lane.b32.xlu0 %v2965_v46, %s2844_s27 }
 0x234   :  { %229 = vrot.lane.b32.xlu1 %v2959_v45, %s2843_s26 }
 0x29a   :  { %v2974_v47 = vpop.permute.xlu1 %220  ;;  %v2976_v48 = vpop.permute.xlu0 %218 }
 0x29b   :  { %389 = vrot.lane.b32.xlu0 %v2974_v47, %s2844_s27  ;;  %313 = vrot.lane.b32.xlu1 %v2976_v48, %s2844_s27 }
 0x29e   :  { %v2980_v49 = vpop.permute.xlu1 %222  ;;  %v2982_v50 = vpop.permute.xlu0 %227 }
 0x29f   :  { %541 = vrot.lane.b32.xlu0 %v2959_v45, %s2844_s27  ;;  %465 = vrot.lane.b32.xlu1 %v2980_v49, %s2844_s27 }
 0x2a2   :  { %v2986_v51 = vpop.permute.xlu1 %225  ;;  %v237_v52 = vpop.permute.xlu0 %236 }
 0x2a3   :  { %617 = vrot.lane.b32.xlu1 %v2986_v51, %s2844_s27  ;;  %693 = vrot.lane.b32.xlu0 %v2982_v50, %s2844_s27 }
 0x2a4   :  { %2559 = vmatpush3.xpose.msk.msra.mxu0 %vm238_vm6, %v237_v52 }
 0x2a5   :  { %2568 = vmatprep.subr.mxu0 %v2839_v44 }
 0x2a6   :  { %v2992_v53 = vpop.permute.xlu1 %229 }
 0x2a7   :  { %2561 = vmatmul.mubr.msk.f32.vlgmr.msra.gmra.mxu0 %vm238_vm6, %v2965_v46  ;;  %769 = vrot.lane.b32.xlu1 %v2992_v53, %s2844_s27 }
 0x2a8   :  { %2570 = vmatprep.mubr.msk.f32.mxu0 %vm2840_vm5, %v2839_v44 }
 0x30d   :  { %v314_v54 = vpop.permute.xlu1 %313  ;;  %v390_v55 = vpop.permute.xlu0 %389 }
 0x30e   :  { %2564 = vmatpush3.xpose.msk.msra.mxu1 %vm238_vm6, %v314_v54  ;;  %2569 = vmatpush3.xpose.msk.msra.mxu0 %vm238_vm6, %v390_v55 }
 0x30f   :  { %2573 = vmatprep.subr.mxu1 %v2839_v44  ;;  %2578 = vmatprep.subr.mxu0 %v2839_v44 }
 0x311   :  { %2566 = vmatmul.mubr.msk.f32.vlgmr.msra.gmra.mxu1 %vm238_vm6, %v2976_v48  ;;  %v466_v56 = vpop.permute.xlu1 %465  ;;  %2571 = vmatmul.mubr.msk.f32.vlgmr.msra.gmra.mxu0 %vm238_vm6, %v2974_v47  ;;  %v542_v57 = vpop.permute.xlu0 %541 }
 0x312   :  { %2574 = vmatpush3.xpose.msk.msra.mxu1 %vm238_vm6, %v466_v56  ;;  %2579 = vmatpush3.xpose.msk.msra.mxu0 %vm238_vm6, %v542_v57 }
 0x313   :  { %2575 = vmatprep.mubr.msk.f32.mxu1 %vm2840_vm5, %v2839_v44  ;;  %2580 = vmatprep.mubr.msk.f32.mxu0 %vm2840_vm5, %v2839_v44 }
 0x314   :  { %2583 = vmatprep.subr.mxu1 %v2839_v44  ;;  %2588 = vmatprep.subr.mxu0 %v2839_v44 }
 0x315   :  { %2576 = vmatmul.mubr.msk.f32.vlgmr.msra.gmra.mxu1 %vm238_vm6, %v2980_v49  ;;  %v618_v58 = vpop.permute.xlu1 %617  ;;  %2581 = vmatmul.mubr.msk.f32.vlgmr.msra.gmra.mxu0 %vm238_vm6, %v2959_v45  ;;  %v694_v59 = vpop.permute.xlu0 %693 }
 0x316   :  { %2584 = vmatpush3.xpose.msk.msra.mxu1 %vm238_vm6, %v618_v58  ;;  %2589 = vmatpush3.xpose.msk.msra.mxu0 %vm238_vm6, %v694_v59 }
 0x317   :  { %2585 = vmatprep.mubr.msk.f32.mxu1 %vm2840_vm5, %v2839_v44  ;;  %2590 = vmatprep.mubr.msk.f32.mxu0 %vm2840_vm5, %v2839_v44 }
 0x318   :  { %2593 = vmatprep.subr.mxu1 %v2839_v44  ;;  %2598 = vmatprep.subr.mxu0 %v2839_v44 }
 0x319   :  { %2586 = vmatmul.mubr.msk.f32.vlgmr.msra.gmra.mxu1 %vm238_vm6, %v2986_v51  ;;  %v770_v60 = vpop.permute.xlu1 %769  ;;  %2591 = vmatmul.mubr.msk.f32.vlgmr.msra.gmra.mxu0 %vm238_vm6, %v2982_v50 }
 0x31a   :  { %2594 = vmatpush3.xpose.msk.msra.mxu1 %vm238_vm6, %v770_v60  ;;  %2595 = vmatprep.mubr.msk.f32.mxu1 %vm2840_vm5, %v2839_v44 }
 0x31b   :  { %2603 = vmatprep.subr.mxu1 %v2839_v44  ;;  %2600 = vmatprep.mubr.msk.f32.mxu0 %vm2840_vm5, %v2839_v44 }
 0x31d   :  { %2596 = vmatmul.mubr.msk.f32.vlgmr.msra.gmra.mxu1 %vm238_vm6, %v2992_v53 }
 0x31e   :  { %2605 = vmatprep.mubr.msk.f32.mxu1 %vm2840_vm5, %v2839_v44 }
 0x367   :  { %v309_v6 = vpop.f32.mrf.mxu0 }
 0x368   :  { %v857_v7 = vsel %vm855_vm8, -1e+09, %v309_v6 }
 0x369   :  { %v2562_v8 = vpop.f32.mrf.mxu0  ;;  %v865_v9 = vsel %vm238_vm6, %v857_v7, -inf }
 0x36a   :  { %866 = vmax.xlane.f32.xlu0 %v865_v9 }
 0x3d1   :  { %v385_v12 = vpop.f32.mrf.mxu1  ;;  %v461_v13 = vpop.f32.mrf.mxu0 }
 0x3d2   :  { %v858_v15 = vsel %vm855_vm8, -1e+09, %v385_v12  ;;  %v859_v16 = vsel %vm855_vm8, -1e+09, %v461_v13 }
 0x3d3   :  { %v2567_v17 = vpop.f32.mrf.mxu1  ;;  %v2572_v18 = vpop.f32.mrf.mxu0  ;;  %v868_v19 = vsel %vm238_vm6, %v858_v15, -inf  ;;  %v871_v20 = vsel %vm238_vm6, %v859_v16, -inf }
 0x3d4   :  { %869 = vmax.xlane.f32.xlu1 %v868_v19  ;;  %872 = vmax.xlane.f32.xlu0 %v871_v20 }
 0x3d5   :  { %v537_v21 = vpop.f32.mrf.mxu1  ;;  %v613_v22 = vpop.f32.mrf.mxu0 }
 0x3d6   :  { %v860_v23 = vsel %vm855_vm8, -1e+09, %v537_v21  ;;  %v861_v27 = vsel %vm856_vm10, -1e+09, %v613_v22 }
 0x3d7   :  { %v2577_v24 = vpop.f32.mrf.mxu1  ;;  %v2582_v25 = vpop.f32.mrf.mxu0  ;;  %v874_v26 = vsel %vm238_vm6, %v860_v23, -inf  ;;  %v877_v34 = vsel %vm238_vm6, %v861_v27, -inf }
 0x3d8   :  { %875 = vmax.xlane.f32.xlu0 %v874_v26 }
 0x3d9   :  { %v689_v28 = vpop.f32.mrf.mxu1  ;;  %v765_v29 = vpop.f32.mrf.mxu0 }
 0x3da   :  { %v862_v30 = vsel %vm856_vm10, -1e+09, %v689_v28  ;;  %v863_v35 = vsel %vm856_vm10, -1e+09, %v765_v29 }
 0x3db   :  { %v2587_v31 = vpop.f32.mrf.mxu1  ;;  %v2592_v32 = vpop.f32.mrf.mxu0  ;;  %v880_v33 = vsel %vm238_vm6, %v862_v30, -inf  ;;  %v883_v40 = vsel %vm238_vm6, %v863_v35, -inf }
 0x3dc   :  { %881 = vmax.xlane.f32.xlu1 %v880_v33  ;;  %878 = vmax.xlane.f32.xlu0 %v877_v34 }
 0x3dd   :  { %v841_v36 = vpop.f32.mrf.mxu1 }
 0x3de   :  { %v864_v37 = vsel %vm856_vm10, -1e+09, %v841_v36 }
 0x3df   :  { %v2597_v38 = vpop.f32.mrf.mxu1  ;;  %v886_v39 = vsel %vm238_vm6, %v864_v37, -inf }
 0x3e0   :  { %887 = vmax.xlane.f32.xlu1 %v886_v39  ;;  %884 = vmax.xlane.f32.xlu0 %v883_v40 }
 0x3f1   :  { %1029 = vrot.lane.b32.xlu1 %v2976_v48, %s2846_s1 }
 0x3f3   :  { %v867_v41 = vpop.xlane.xlu0 %866 }
 0x3f4   :  { %v889_v42 = vsub.f32 %v857_v7, %v867_v41 }
 0x3f5   :  { %1105 = vrot.lane.b32.xlu1 %v2974_v47, %s2846_s1 }
 0x3f6   :  { %953 = vrot.lane.b32.xlu0 %v2965_v46, %s2846_s1  ;;  %v897_v43 = vmul.f32 1.442695, %v889_v42 }
 0x3f8   :  { %2729 = vpow2.f32 %v897_v43 }
 0x3f9   :  { %1181 = vrot.lane.b32.xlu1 %v2980_v49, %s2846_s1 }
 0x3fa   :  { %1257 = vrot.lane.b32.xlu0 %v2959_v45, %s2846_s1 }
 0x3fd   :  { %1333 = vrot.lane.b32.xlu1 %v2986_v51, %s2846_s1 }
 0x405   :  { %v3075_v48 = vpop.eup %2729 }
 0x406   :  { %v913_v47 = vsel %vm238_vm6, %v3075_v48, 0.0 }
 0x419   :  { %914 = vadd.xlane.f32.xlu0 %v913_v47 }
 0x45d   :  { %v870_v46 = vpop.xlane.xlu1 %869  ;;  %v873_v52 = vpop.xlane.xlu0 %872 }
 0x45e   :  { %v890_v54 = vsub.f32 %v858_v15, %v870_v46  ;;  %v891_v49 = vsub.f32 %v859_v16, %v873_v52 }
 0x460   :  { %v899_v55 = vmul.f32 1.442695, %v890_v54  ;;  %v901_v56 = vmul.f32 1.442695, %v891_v49 }
 0x461   :  { %v876_v45 = vpop.xlane.xlu0 %875 }
 0x462   :  { %2731 = vpow2.f32 %v899_v55  ;;  %v892_v57 = vsub.f32 %v860_v23, %v876_v45  ;;  %v1561_v45 = vld [vmem:[%s3246_s3] sm:$0xff] }
 0x463   :  { %2733 = vpow2.f32 %v901_v56 }
 0x464   :  { %v903_v51 = vmul.f32 1.442695, %v892_v57  ;;  %v1562_v57 = vld [vmem:[%s3246_s3 + $0x8] sm:$0xff] }
 0x465   :  { %v882_v58 = vpop.xlane.xlu1 %881  ;;  %v879_v59 = vpop.xlane.xlu0 %878 }
 0x466   :  { %2735 = vpow2.f32 %v903_v51  ;;  %v894_v60 = vsub.f32 %v862_v30, %v882_v58  ;;  %v893_v61 = vsub.f32 %v861_v27, %v879_v59  ;;  %v1563_v51 = vld [vmem:[%s3246_s3 + $0x10] sm:$0xff] }
 0x468   :  { %v907_v62 = vmul.f32 1.442695, %v894_v60  ;;  %v905_v63 = vmul.f32 1.442695, %v893_v61  ;;  %v1564_v60 = vld [vmem:[%s3246_s3 + $0x18] sm:$0xff] }
 0x469   :  { %v888_v2 = vpop.xlane.xlu1 %887  ;;  %v885_v3 = vpop.xlane.xlu0 %884 }
 0x46a   :  { %2737 = vpow2.f32 %v907_v62  ;;  %v896_v4 = vsub.f32 %v864_v37, %v888_v2  ;;  %v895_v5 = vsub.f32 %v863_v35, %v885_v3  ;;  %v1565_v62 = vld [vmem:[%s3246_s3 + $0x20] sm:$0xff] }
 0x46b   :  { %2739 = vpow2.f32 %v905_v63 }
 0x46c   :  { %v911_v6 = vmul.f32 1.442695, %v896_v4  ;;  %v909_v7 = vmul.f32 1.442695, %v895_v5  ;;  %v1566_v4 = vld [vmem:[%s3246_s3 + $0x28] sm:$0xff] }
 0x46d   :  { %v1030_v8 = vpop.permute.xlu1 %1029  ;;  %v954_v9 = vpop.permute.xlu0 %953 }
 0x46e   :  { %2741 = vpow2.f32 %v911_v6  ;;  %2599 = vmatpush3.msra.mxu0 %v954_v9  ;;  %2604 = vmatpush3.msra.mxu1 %v1030_v8  ;;  %v1567_v9 = vld [vmem:[%s3246_s3 + $0x30] sm:$0xff] }
 0x46f   :  { %v2732_v10 = vpop.eup %2731  ;;  %2743 = vpow2.f32 %v909_v7  ;;  %2608 = vmatprep.subr.mxu0 %v2839_v44  ;;  %2613 = vmatprep.subr.mxu1 %v2839_v44  ;;  %v1568_v7 = vld [vmem:[%s3246_s3 + $0x38] sm:$0xff] }
 0x470   :  { %v2734_v11 = vpop.eup %2733  ;;  %v916_v12 = vsel %vm238_vm6, %v2732_v10, 0.0 }
 0x471   :  { %917 = vadd.xlane.f32.xlu1 %v916_v12  ;;  %v919_v13 = vsel %vm238_vm6, %v2734_v11, 0.0  ;;  %v1258_v24 = vpop.permute.xlu0 %1257  ;;  %v1106_v28 = vpop.permute.xlu1 %1105 }
 0x472   :  { %920 = vadd.xlane.f32.xlu0 %v919_v13 }
 0x473   :  { %v2736_v14 = vpop.eup %2735 }
 0x474   :  { %v922_v15 = vsel %vm238_vm6, %v2736_v14, 0.0 }
 0x475   :  { %923 = vadd.xlane.f32.xlu1 %v922_v15  ;;  %v1182_v29 = vpop.permute.xlu1 %1181 }
 0x477   :  { %v2738_v16 = vpop.eup %2737 }
 0x478   :  { %v2740_v17 = vpop.eup %2739  ;;  %v928_v18 = vsel %vm238_vm6, %v2738_v16, 0.0 }
 0x479   :  { %929 = vadd.xlane.f32.xlu1 %v928_v18  ;;  %v925_v19 = vsel %vm238_vm6, %v2740_v17, 0.0 }
 0x47a   :  { %926 = vadd.xlane.f32.xlu0 %v925_v19 }
 0x47b   :  { %v3086_v20 = vpop.eup %2741 }
 0x47c   :  { %v3088_v21 = vpop.eup %2743  ;;  %v934_v22 = vsel %vm238_vm6, %v3086_v20, 0.0 }
 0x47d   :  { %935 = vadd.xlane.f32.xlu1 %v934_v22  ;;  %v931_v23 = vsel %vm238_vm6, %v3088_v21, 0.0 }
 0x47e   :  { %932 = vadd.xlane.f32.xlu0 %v931_v23 }
 0x48e   :  { %1485 = vrot.lane.b32.xlu1 %v2992_v53, %s2846_s1  ;;  %v1334_v53 = vpop.permute.xlu1 %1333 }
 0x494   :  { %1409 = vrot.lane.b32.xlu0 %v2982_v50, %s2846_s1 }
 0x4a2   :  { %v915_v25 = vpop.xlane.xlu0 %914 }
 0x4a3   :  { %2745 = vrcp.f32 %v915_v25 }
 0x4b0   :  { %v2746_v26 = vpop.eup %2745 }
 0x4b1   :  { %v945_v27 = vmul.f32 %v2746_v26, %v3075_v48 }
 0x4b3   :  { %2601 = vmatmul.mubr.msk.f32.vlgmr.msra.gmra.mxu0 %vm238_vm6, %v945_v27 }
 0x4b4   :  { %2609 = vmatpush3.msra.mxu0 %v1106_v28  ;;  %2610 = vmatprep.mubr.msk.f32.mxu0 %vm2840_vm5, %v2839_v44 }
 0x4b5   :  { %2618 = vmatprep.subr.mxu0 %v2839_v44 }
 0x4fa   :  { %v918_v30 = vpop.xlane.xlu1 %917 }
 0x4fb   :  { %2747 = vrcp.f32 %v918_v30  ;;  %v921_v50 = vpop.xlane.xlu0 %920 }
 0x4fc   :  { %2749 = vrcp.f32 %v921_v50 }
 0x4fe   :  { %v924_v31 = vpop.xlane.xlu1 %923 }
 0x4ff   :  { %2751 = vrcp.f32 %v924_v31 }
 0x502   :  { %v930_v32 = vpop.xlane.xlu1 %929 }
 0x503   :  { %2753 = vrcp.f32 %v930_v32  ;;  %v927_v33 = vpop.xlane.xlu0 %926 }
 0x504   :  { %2755 = vrcp.f32 %v927_v33 }
 0x506   :  { %v936_v34 = vpop.xlane.xlu1 %935 }
 0x507   :  { %2757 = vrcp.f32 %v936_v34  ;;  %v933_v35 = vpop.xlane.xlu0 %932 }
 0x508   :  { %v2748_v36 = vpop.eup %2747  ;;  %2759 = vrcp.f32 %v933_v35 }
 0x509   :  { %v2750_v37 = vpop.eup %2749  ;;  %v946_v38 = vmul.f32 %v2748_v36, %v2732_v10 }
 0x50a   :  { %v947_v39 = vmul.f32 %v2750_v37, %v2734_v11  ;;  %v1486_v46 = vpop.permute.xlu1 %1485 }
 0x50b   :  { %2606 = vmatmul.mubr.msk.f32.vlgmr.msra.gmra.mxu1 %vm238_vm6, %v946_v38  ;;  %v1410_v54 = vpop.permute.xlu0 %1409 }
 0x50c   :  { %v2752_v40 = vpop.eup %2751  ;;  %2611 = vmatmul.mubr.msk.f32.vlgmr.msra.gmra.mxu0 %vm238_vm6, %v947_v39  ;;  %2614 = vmatpush3.msra.mxu1 %v1182_v29 }
 0x50d   :  { %2619 = vmatpush3.msra.mxu0 %v1258_v24  ;;  %2615 = vmatprep.mubr.msk.f32.mxu1 %vm2840_vm5, %v2839_v44  ;;  %v948_v41 = vmul.f32 %v2752_v40, %v2736_v14 }
 0x50e   :  { %2623 = vmatprep.subr.mxu1 %v2839_v44  ;;  %2620 = vmatprep.mubr.msk.f32.mxu0 %vm2840_vm5, %v2839_v44 }
 0x50f   :  { %2616 = vmatmul.mubr.msk.f32.vlgmr.msra.gmra.mxu1 %vm238_vm6, %v948_v41  ;;  %2628 = vmatprep.subr.mxu0 %v2839_v44 }
 0x510   :  { %v2754_v42 = vpop.eup %2753  ;;  %2624 = vmatpush3.msra.mxu1 %v1334_v53  ;;  %2625 = vmatprep.mubr.msk.f32.mxu1 %vm2840_vm5, %v2839_v44 }
 0x511   :  { %v2756_v43 = vpop.eup %2755  ;;  %2633 = vmatprep.subr.mxu1 %v2839_v44  ;;  %v950_v48 = vmul.f32 %v2754_v42, %v2738_v16 }
 0x512   :  { %v949_v47 = vmul.f32 %v2756_v43, %v2740_v17 }
 0x513   :  { %2626 = vmatmul.mubr.msk.f32.vlgmr.msra.gmra.mxu1 %vm238_vm6, %v950_v48 }
 0x514   :  { %v2758_v52 = vpop.eup %2757  ;;  %2621 = vmatmul.mubr.msk.f32.vlgmr.msra.gmra.mxu0 %vm238_vm6, %v949_v47  ;;  %2634 = vmatpush3.msra.mxu1 %v1486_v46 }
 0x515   :  { %v2760_v49 = vpop.eup %2759  ;;  %2629 = vmatpush3.msra.mxu0 %v1410_v54  ;;  %2630 = vmatprep.mubr.msk.f32.mxu0 %vm2840_vm5, %v2839_v44  ;;  %v952_v55 = vmul.f32 %v2758_v52, %v3086_v20  ;;  %v2222_v54 = vld [vmem:[#allocation5 + $0x18] sm:$0xff] }
 0x516   :  { %2635 = vmatprep.mubr.msk.f32.mxu1 %vm2840_vm5, %v2839_v44  ;;  %v951_v56 = vmul.f32 %v2760_v49, %v3088_v21  ;;  %2638 = vmatprep.subr.mxu0 %v2839_v44  ;;  %v2221_v49 = vld [vmem:[#allocation5 + $0x10] sm:$0xff] }
 0x517   :  { %2636 = vmatmul.mubr.msk.f32.vlgmr.msra.gmra.mxu1 %vm238_vm6, %v952_v55  ;;  %2643 = vmatprep.subr.mxu1 %v2839_v44  ;;  %v2220_v55 = vld [vmem:[#allocation5 + $0x8] sm:$0xff] }
 0x518   :  { %2631 = vmatmul.mubr.msk.f32.vlgmr.msra.gmra.mxu0 %vm238_vm6, %v951_v56  ;;  %2645 = vmatprep.mubr.msk.f32.mxu1 %vm2840_vm5, %v2839_v44  ;;  %v2219_v56 = vld [vmem:[#allocation5] sm:$0xff] }
 0x519   :  { %2639 = vmatpush3.msra.mxu0 %v1561_v45  ;;  %2640 = vmatprep.mubr.msk.f32.mxu0 %vm2840_vm5, %v2839_v44  ;;  %v2320_v45 = vld [vmem:[%s3249_s6 + $0x38] sm:$0xff] }
 0x51a   :  { %2648 = vmatprep.subr.mxu0 %v2839_v44  ;;  %2644 = vmatpush3.msra.mxu1 %v1562_v57  ;;  %v2319_v57 = vld [vmem:[%s3249_s6 + $0x30] sm:$0xff] }
 0x51b   :  { %2653 = vmatprep.subr.mxu1 %v2839_v44 }
 0x573   :  { %v1025_v58 = vpop.f32.mrf.mxu0 }
 0x574   :  { %2641 = vmatmul.mubr.msk.f32.vlgmr.msra.gmra.mxu0 %vm238_vm6, %v1025_v58  ;;  %v2317_v58 = vld [vmem:[%s3249_s6 + $0x20] sm:$0xff] }
 0x575   :  { %v2602_v59 = vpop.f32.mrf.mxu0  ;;  %2649 = vmatpush3.msra.mxu0 %v1563_v51  ;;  %2650 = vmatprep.mubr.msk.f32.mxu0 %vm2840_vm5, %v2839_v44  ;;  %v2318_v51 = vld [vmem:[%s3249_s6 + $0x28] sm:$0xff] }
 0x576   :  { %2658 = vmatprep.subr.mxu0 %v2839_v44 }
 0x5cb   :  { %v1101_v61 = vpop.f32.mrf.mxu1 }
 0x5cc   :  { %v1177_v63 = vpop.f32.mrf.mxu0  ;;  %2646 = vmatmul.mubr.msk.f32.vlgmr.msra.gmra.mxu1 %vm238_vm6, %v1101_v61 }
 0x5cd   :  { %2651 = vmatmul.mubr.msk.f32.vlgmr.msra.gmra.mxu0 %vm238_vm6, %v1177_v63  ;;  %v2607_v2 = vpop.f32.mrf.mxu1  ;;  %2654 = vmatpush3.msra.mxu1 %v1564_v60 }
 0x5ce   :  { %v2612_v3 = vpop.f32.mrf.mxu0  ;;  %2655 = vmatprep.mubr.msk.f32.mxu1 %vm2840_vm5, %v2839_v44  ;;  %2659 = vmatpush3.msra.mxu0 %v1565_v62 }
 0x5cf   :  { %v1253_v5 = vpop.f32.mrf.mxu1  ;;  %2663 = vmatprep.subr.mxu1 %v2839_v44  ;;  %2660 = vmatprep.mubr.msk.f32.mxu0 %vm2840_vm5, %v2839_v44 }
 0x5d0   :  { %2656 = vmatmul.mubr.msk.f32.vlgmr.msra.gmra.mxu1 %vm238_vm6, %v1253_v5  ;;  %2668 = vmatprep.subr.mxu0 %v2839_v44 }
 0x5d1   :  { %v2617_v6 = vpop.f32.mrf.mxu1  ;;  %2664 = vmatpush3.msra.mxu1 %v1566_v4  ;;  %2665 = vmatprep.mubr.msk.f32.mxu1 %vm2840_vm5, %v2839_v44 }
 0x5d2   :  { %2673 = vmatprep.subr.mxu1 %v2839_v44 }
 0x5d3   :  { %v1405_v8 = vpop.f32.mrf.mxu1 }
 0x5d4   :  { %v1329_v10 = vpop.f32.mrf.mxu0  ;;  %2666 = vmatmul.mubr.msk.f32.vlgmr.msra.gmra.mxu1 %vm238_vm6, %v1405_v8 }
 0x5d5   :  { %2661 = vmatmul.mubr.msk.f32.vlgmr.msra.gmra.mxu0 %vm238_vm6, %v1329_v10  ;;  %v2627_v11 = vpop.f32.mrf.mxu1  ;;  %2674 = vmatpush3.msra.mxu1 %v1568_v7 }
 0x5d6   :  { %v2622_v12 = vpop.f32.mrf.mxu0  ;;  %2669 = vmatpush3.msra.mxu0 %v1567_v9  ;;  %2670 = vmatprep.mubr.msk.f32.mxu0 %vm2840_vm5, %v2839_v44 }
 0x5d7   :  { %v1557_v13 = vpop.f32.mrf.mxu1  ;;  %2675 = vmatprep.mubr.msk.f32.mxu1 %vm2840_vm5, %v2839_v44  ;;  %2678 = vmatprep.subr.mxu0 %v2222_v54  ;;  %v2469_v12 = vld [vmem:[%s3253_s10] ss:$0 sm:$0xff] }
 0x5d8   :  { %v1481_v14 = vpop.f32.mrf.mxu0  ;;  %2676 = vmatmul.mubr.msk.f32.vlgmr.msra.gmra.mxu1 %vm238_vm6, %v1557_v13  ;;  %2689 = vmatprep.subr.mxu1 %v2320_v45 }
 0x5d9   :  { %2671 = vmatmul.mubr.msk.f32.vlgmr.msra.gmra.mxu0 %vm238_vm6, %v1481_v14  ;;  %v2637_v15 = vpop.f32.mrf.mxu1  ;;  %2690 = vmatpush3.msra.mxu1 %v2320_v45 }
 0x5da   :  { %v2632_v16 = vpop.f32.mrf.mxu0  ;;  %2679 = vmatpush3.msra.mxu0 %v2222_v54  ;;  %2691 = vmatprep.subr.mxu1 %v2319_v57 }
 0x5db   :  { %2680 = vmatprep.subr.mxu0 %v2221_v49  ;;  %2692 = vmatpush3.msra.mxu1 %v2319_v57  ;;  %v2470_v16 = vld [vmem:[%s3254_s11] ss:$0 sm:$0xff] }
 0x5dc   :  { %2681 = vmatpush3.msra.mxu0 %v2221_v49  ;;  %2693 = vmatprep.subr.mxu1 %v2318_v51 }
 0x5dd   :  { %2682 = vmatprep.subr.mxu0 %v2220_v55  ;;  %2694 = vmatpush3.msra.mxu1 %v2318_v51 }
 0x5de   :  { %2683 = vmatpush3.msra.mxu0 %v2220_v55  ;;  %2695 = vmatprep.subr.mxu1 %v2317_v58 }
 0x5df   :  { %2684 = vmatprep.subr.mxu0 %v2219_v56  ;;  %2696 = vmatpush3.msra.mxu1 %v2317_v58 }
 0x5e0   :  { %2685 = vmatpush3.msra.mxu0 %v2219_v56 }
 0x634   :  { %v1638_v17 = vpop.f32.mrf.mxu0 }
 0x636   :  { %v2642_v18 = vpop.f32.mrf.mxu0 }
 0x68c   :  { %v1711_v19 = vpop.f32.mrf.mxu1 }
 0x68d   :  { %v2153_v20 = vadd.f32 %v1711_v19, %v1638_v17  ;;  %v1784_v21 = vpop.f32.mrf.mxu0 }
 0x68e   :  { %v2647_v22 = vpop.f32.mrf.mxu1 }
 0x68f   :  { %v2154_v23 = vadd.f32 %v2153_v20, %v1784_v21  ;;  %v2652_v24 = vpop.f32.mrf.mxu0 }
 0x690   :  { %v1857_v25 = vpop.f32.mrf.mxu1  ;;  %v2315_v24 = vld [vmem:[%s3249_s6 + $0x10] sm:$0xff] }
 0x691   :  { %v2155_v26 = vadd.f32 %v2154_v23, %v1857_v25  ;;  %v2316_v23 = vld [vmem:[%s3249_s6 + $0x18] sm:$0xff]  ;;  %v2314_v25 = vld [vmem:[%s3249_s6 + $0x8] sm:$0xff] }
 0x692   :  { %v2657_v27 = vpop.f32.mrf.mxu1  ;;  %2697 = vmatprep.subr.mxu1 %v2316_v23 }
 0x693   :  { %v3182_v44 = vadd.f32 %v2155_v26, %v2925_v0  ;;  %2698 = vmatpush3.msra.mxu1 %v2316_v23  ;;  %v2313_v26 = vld [vmem:[%s3249_s6] sm:$0xff]  ;;  %s2847_s6 = smov [#allocation7]  }
 0x694   :  { %v2003_v28 = vpop.f32.mrf.mxu1  ;;  %2699 = vmatprep.subr.mxu1 %v2315_v24  ;;  %v2471_v27 = vld [vmem:[%s3248_s5] ss:$0 sm:$0xff]  ;;  %s2419_s26 = sshll.u32 %s2847_s6, 4  ;;  %s2420_s26 = int_to_ptr.vmem [resolvable:$true] %s2419_s26 }
 0x695   :  { %v1930_v29 = vpop.f32.mrf.mxu0  ;;  %v2163_v53 = vsel %vm74_vm0, %v3182_v44, 0.0  ;;  %2700 = vmatpush3.msra.mxu1 %v2315_v24  ;;  %s2809_s5 = scalar_lea.vmem %s2420_s26, 256  ;;  %p2814_p11 = scmp.lt.s32.totalorder %s2420_s26, %s2420_s26 }
 0x696   :  { %v2667_v30 = vpop.f32.mrf.mxu1  ;;  %2164 = vadd.xlane.f32.xlu0 %v2163_v53  ;;  %v2156_v31 = vadd.f32 %v2003_v28, %v1930_v29  ;;  %2701 = vmatprep.subr.mxu1 %v2314_v25  ;;  %p2810_p10 = scmp.ne.s32.totalorder %s2420_s26, %s2809_s5  ;;  %p2815_p12 = scmp.lt.s32.totalorder %s2809_s5, %s2809_s5 }
 0x697   :  { %v2662_v50 = vpop.f32.mrf.mxu0  ;;  %2702 = vmatpush3.msra.mxu1 %v2314_v25 }
 0x698   :  { %v2149_v32 = vpop.f32.mrf.mxu1  ;;  %2703 = vmatprep.subr.mxu1 %v2313_v26  ;;  %p2816_p13 = por %p2815_p12, %p2814_p11 }
 0x699   :  { %v2076_v33 = vpop.f32.mrf.mxu0  ;;  %2704 = vmatpush3.msra.mxu1 %v2313_v26 }
 0x69a   :  { %v2157_v34 = vadd.f32 %v2156_v31, %v2076_v33  ;;  %v2677_v35 = vpop.f32.mrf.mxu1  ;;  %p2817_p0 = pnand %p2816_p13, %p2810_p10 }
 0x69b   :  { %v2672_v36 = vpop.f32.mrf.mxu0 }
 0x69c   :  { %v2158_v37 = vadd.f32 %v2157_v34, %v2149_v32  ;;  %v2474_v32 = vld [vmem:[%s3250_s7] ss:$0 sm:$0xff] }
 0x69e   :  { %v3187_v38 = vadd.f32 %v2158_v37, %v2927_v1 }
 0x6a0   :  { %v2166_v0 = vsel %vm74_vm0, %v3187_v38, 0.0 }
 0x6a1   :  { %2167 = vadd.xlane.f32.xlu1 %v2166_v0 }
 0x71f   :  { %v2165_v39 = vpop.xlane.xlu0 %2164 }
 0x720   :  { %v2169_v40 = vmul.f32 0.03125, %v2165_v39 }
 0x722   :  { %v2171_v41 = vsub.f32 %v3182_v44, %v2169_v40 }
 0x724   :  { %v2173_v42 = vmul.f32 %v2171_v41, %v2171_v41  ;;  %v2207_v14 = vmul.f32 %v2469_v12, %v2171_v41 }
 0x726   :  { %v2175_v43 = vsel %vm74_vm0, %v2173_v42, 0.0 }
 0x727   :  { %2176 = vadd.xlane.f32.xlu0 %v2175_v43 }
 0x72a   :  { %v2168_v48 = vpop.xlane.xlu1 %2167 }
 0x72b   :  { %v2170_v47 = vmul.f32 0.03125, %v2168_v48 }
 0x72d   :  { %v2172_v46 = vsub.f32 %v3187_v38, %v2170_v47 }
 0x72f   :  { %v2174_v52 = vmul.f32 %v2172_v46, %v2172_v46  ;;  %v2208_v19 = vmul.f32 %v2469_v12, %v2172_v46 }
 0x731   :  { %v2178_v1 = vsel %vm74_vm0, %v2174_v52, 0.0 }
 0x732   :  { %2179 = vadd.xlane.f32.xlu0 %v2178_v1 }
 0x7b0   :  { %v2177_v59 = vpop.xlane.xlu0 %2176 }
 0x7b1   :  { %v2181_v60 = vmul.f32 0.032258064, %v2177_v59 }
 0x7b3   :  { %2761 = vrsqrt.f32 %v2181_v60  ;;  %vm2185_vm11 = vcmp.eq.f32.partialorder %v2181_v60, inf  ;;  %v2188_v3 = vand.u32 2147483648, %v2181_v60  ;;  %vm2187_vm12 = vcmp.eq.f32.partialorder %v2181_v60, 0.0 }
 0x7bb   :  { %v2180_v61 = vpop.xlane.xlu0 %2179 }
 0x7bc   :  { %v2182_v62 = vmul.f32 0.032258064, %v2180_v61 }
 0x7be   :  { %2763 = vrsqrt.f32 %v2182_v62  ;;  %vm2192_vm13 = vcmp.eq.f32.partialorder %v2182_v62, inf  ;;  %v2195_v9 = vand.u32 2147483648, %v2182_v62  ;;  %vm2194_vm14 = vcmp.eq.f32.partialorder %v2182_v62, 0.0 }
 0x7c0   :  { %v2762_v63 = vpop.eup %2761 }
 0x7c1   :  { %v2184_v2 = vmul.f32 %v2762_v63, %v2181_v60 }
 0x7c3   :  { %v2186_v4 = vsel %vm2185_vm11, %v2181_v60, %v2184_v2 }
 0x7c4   :  { %v2189_v5 = vsel %vm2187_vm12, %v2188_v3, %v2186_v4 }
 0x7c5   :  { %v2197_v6 = vadd.f32 1e-06, %v2189_v5 }
 0x7c7   :  { %2765 = vrcp.f32 %v2197_v6 }
 0x7cb   :  { %v2764_v7 = vpop.eup %2763 }
 0x7cc   :  { %v2191_v8 = vmul.f32 %v2764_v7, %v2182_v62 }
 0x7ce   :  { %v2193_v10 = vsel %vm2192_vm13, %v2182_v62, %v2191_v8 }
 0x7cf   :  { %v2196_v11 = vsel %vm2194_vm14, %v2195_v9, %v2193_v10 }
 0x7d0   :  { %v2198_v13 = vadd.f32 1e-06, %v2196_v11 }
 0x7d2   :  { %2767 = vrcp.f32 %v2198_v13 }
 0x7d4   :  { %v2766_v15 = vpop.eup %2765 }
 0x7d5   :  { %v2209_v17 = vmul.f32 %v2766_v15, %v2207_v14 }
 0x7d7   :  { %v2217_v18 = vadd.f32 %v2470_v16, %v2209_v17 }
 0x7d9   :  { %2686 = vmatprep.mubr.msk.f32.mxu0 %vm74_vm0, %v2217_v18 }
 0x7df   :  { %v2768_v20 = vpop.eup %2767 }
 0x7e0   :  { %v2210_v21 = vmul.f32 %v2768_v20, %v2208_v19 }
 0x7e2   :  { %v2218_v22 = vadd.f32 %v2470_v16, %v2210_v21 }
 0x7e4   :  { %2687 = vmatmul.mubr.msk.f32.vlgmr.msra.gmra.mxu0 %vm74_vm0, %v2218_v22 }
 0x8a4   :  { %v2688_v28 = vpop.f32.mrf.mxu0 }
 0x8a5   :  { %v2308_v29 = vadd.f32 %v2688_v28, %v2471_v27 }
 0x8a6   :  { %v2302_v53 = vpop.f32.mrf.mxu0 }
 0x8a7   :  { %v2303_v30 = vadd.f32 %v2471_v27, %v2302_v53  ;;  %v2312_v31 = vmax.f32 %v2308_v29, 0.0 }
 0x8a9   :  { %v2311_v50 = vmax.f32 %v2303_v30, 0.0 }
 0x8ab   :  { %2705 = vmatprep.mubr.msk.f32.mxu1 %vm2328_vm15, %v2311_v50 }
 0x8ac   :  { %2706 = vmatmul.mubr.msk.f32.vlgmr.msra.gmra.mxu1 %vm2328_vm15, %v2312_v31 }
 0x96c   :  { %v2707_v33 = vpop.f32.mrf.mxu1 }
 0x96d   :  { %v2407_v34 = vadd.f32 %v2707_v33, %v2474_v32 }
 0x96e   :  { %v2401_v35 = vpop.f32.mrf.mxu1 }
 0x96f   :  { %v2411_v36 = vadd.f32 %v2407_v34, %v3187_v38  ;;  %v2402_v37 = vadd.f32 %v2474_v32, %v2401_v35 }
 0x971   :  { %2413 = vst.msk [vmem:[#allocation7 + $0x8] sm:$0xff] %vm74_vm0, %v2411_v36  ;;  %v2410_v0 = vadd.f32 %v2402_v37, %v3182_v44 }
 0x973   :  { %2412 = vst.msk [vmem:[#allocation7] sm:$0xff] %vm74_vm0, %v2410_v0 }
 0x974   :  { %2820 = shalt.err (!%p2817_p0)
}
 0x975   :  { %2425 = dma.vmem_to_hbm [thread:$0]  %s2420_s26, 256, %s3255_s12, [#allocation4], %s2836_s24, %s2836_s24, %s2837_s25  }
 0x976   :  { %2833 = dma.done.wait [#allocation4], 256  }
 0x977   :  { %2834 = vsyncadd [#allocation4], 4294967040 }
 0x978   :  { %2429 = vsyncpa [#allocation3], 1 }
 0x979   :  { %2430 = vsyncpa [#allocation6], 1 }
 0x97a   :  { %2431 = vsyncpa [#allocation4], 1 }

</bundles_post_ra>
